<compile_context>
chip_gen: v5e
topology: v5e:2x2
jax: 0.10.0
libtpu: 0.0.40
codegen_flags: <defaults>
</compile_context>

<pallas_src>
import functools

import jax
import jax.numpy as jnp
from jax import lax
from jax.experimental import pallas as pl
from jax.experimental.pallas import tpu as pltpu


def _mlp_proto_kernel(x_ref, w1_ref, b1_ref, w2_ref, b2_ref, o_ref):
    # Request full-precision multi-pass MXU matmuls only when inputs are f32;
    # bf16 inputs use the native bf16 MXU path with f32 accumulation.
    prec = lax.Precision.HIGHEST if w1_ref.dtype == jnp.float32 else None
    # Layer 1: MXU matmul (f32 accumulation); bias add + ReLU in f32 on the VPU.
    x = x_ref[...].astype(w1_ref.dtype)
    h = jnp.dot(x, w1_ref[...], preferred_element_type=jnp.float32,
                precision=prec)
    h = jnp.maximum(h + b1_ref[...], 0.0)
    # Layer 2: cast the activation to the matmul dtype, accumulate in f32.
    out = jnp.dot(h.astype(w2_ref.dtype), w2_ref[...],
                  preferred_element_type=jnp.float32, precision=prec)
    o_ref[...] = (out + b2_ref[...]).astype(o_ref.dtype)


def _mlp_proto_forward(x, w1, b1, w2, b2, *, block_m):
    """x: (B, in); w1: (in, hidden); b1: (1, hidden) f32; w2: (hidden, hidden);
    b2: (1, hidden) f32.  Returns (B, hidden) in x.dtype (x @ W1 + b1 -> ReLU ->
    @ W2 + b2, i.e. PyTorch's Linear->ReLU->Linear with pre-transposed weights).
    """
    B, in_features = x.shape
    hidden = w1.shape[1]
    out_dtype = x.dtype
    x_item = jnp.dtype(x.dtype).itemsize
    w_item = jnp.dtype(w1.dtype).itemsize
    o_item = jnp.dtype(out_dtype).itemsize

    weight_bytes = (in_features * hidden + hidden * hidden) * w_item + 2 * hidden * 4
    flops = 2 * B * hidden * (in_features + hidden)
    bytes_accessed = B * in_features * x_item + weight_bytes + B * hidden * o_item
    cost = pl.CostEstimate(flops=int(flops), transcendentals=0,
                           bytes_accessed=int(bytes_accessed))
    out_shape = jax.ShapeDtypeStruct((B, hidden), out_dtype)

    # Enough grid steps to amortize per-step overhead (~0.35 us) and give each
    # v7x TensorCore a pipelined stream of >= 4 steps.
    MIN_GRID_BLOCKS = 8
    GRIDLESS_VMEM_BUDGET = 16 * 1024 * 1024
    # Whole-problem VMEM footprint if run gridless (x, out, f32 h, weights).
    whole_bytes = (B * in_features * x_item + B * hidden * o_item
                   + B * hidden * 4 + weight_bytes)

    tiled = (pl.cdiv(B, block_m) >= MIN_GRID_BLOCKS
             or whole_bytes > GRIDLESS_VMEM_BUDGET)

    if not tiled:
        # Small problem: no grid, no pipeline prologue/epilogue; every operand
        # is handed to the kernel whole, at its true (unpadded) shape, in VMEM.
        return pl.pallas_call(
            _mlp_proto_kernel,
            out_shape=out_shape,
            in_specs=[pl.BlockSpec(memory_space=pltpu.MemorySpace.VMEM)] * 5,
            out_specs=pl.BlockSpec(memory_space=pltpu.MemorySpace.VMEM),
            cost_estimate=cost,
        )(x, w1, b1, w2, b2)

    # Tiled path: x/out stream through VMEM (auto double-buffered) in
    # block_m-row tiles; weights/biases use a constant index_map with a single
    # buffer so they stay VMEM-resident across the whole grid.
    bm = block_m
    while pl.cdiv(B, bm) < MIN_GRID_BLOCKS and bm > 64:
        bm //= 2                              # stays a multiple of 8
    n_blocks = pl.cdiv(B, bm)                 # ragged last block is masked

    resident = dict(pipeline_mode=pl.Buffered(1))
    est = (2 * bm * in_features * x_item      # double-buffered x tiles
           + 2 * bm * hidden * o_item         # double-buffered out tiles
           + weight_bytes                     # resident w1/w2/b1/b2
           + bm * hidden * 4)                 # f32 h intermediate
    # v7x has only 64 MiB physical VMEM per TensorCore: keep headroom.
    vmem_limit = int(min(max(2 * est, 32 * 1024 * 1024), 56 * 1024 * 1024))
    # TODO(synk): for very large `hidden` (w2 approaching ~1/3 of v7x's 64 MiB
    # per-TC VMEM) add an N/K grid axis over the hidden dim with an f32 VMEM
    # accumulator instead of holding w2 whole.

    return pl.pallas_call(
        _mlp_proto_kernel,
        out_shape=out_shape,
        grid=(n_blocks,),
        in_specs=[
            pl.BlockSpec((bm, in_features), lambda i: (i, 0)),
            pl.BlockSpec((in_features, hidden), lambda i: (0, 0), **resident),
            pl.BlockSpec((1, hidden), lambda i: (0, 0), **resident),
            pl.BlockSpec((hidden, hidden), lambda i: (0, 0), **resident),
            pl.BlockSpec((1, hidden), lambda i: (0, 0), **resident),
        ],
        out_specs=pl.BlockSpec((bm, hidden), lambda i: (i, 0)),
        compiler_params=pltpu.CompilerParams(
            dimension_semantics=("parallel",),
            vmem_limit_bytes=vmem_limit,
        ),
        cost_estimate=cost,
    )(x, w1, b1, w2, b2)


class MLPProtoPallas:
    """Pallas-TPU forward of MLPProto (Linear -> ReLU -> Linear).

    Weights are stored pre-transposed ((in, hidden), (hidden, hidden)) so the
    kernel computes x @ W + b, equivalent to PyTorch's x @ W.T + b.  Weight
    casts happen once here, never inside the per-call hot path.
    """

    def __init__(self, w1, b1, w2, b2, *,
                 compute_dtype=jnp.bfloat16, block_m=512):
        hidden = w1.shape[1]
        self.w1 = jnp.asarray(w1, compute_dtype)
        self.w2 = jnp.asarray(w2, compute_dtype)
        # Biases stay f32: the bias-add / ReLU epilogue runs in f32.
        self.b1 = jnp.asarray(b1, jnp.float32).reshape(1, hidden)
        self.b2 = jnp.asarray(b2, jnp.float32).reshape(1, hidden)
        self._fwd = jax.jit(functools.partial(_mlp_proto_forward,
                                              block_m=block_m))

    def __call__(self, x):
        return self._fwd(x, self.w1, self.b1, self.w2, self.b2)


def reference_forward(x, w1, b1, w2, b2):
    h = jnp.maximum(x @ w1 + b1, 0.0)
    return h @ w2 + b2


if __name__ == "__main__":
    # MLPProto(in_features=32, out_features=..., hidden_sizes=32):
    # encoder = Linear(32, 32) -> ReLU -> Linear(32, 32).  drop_p is unused in
    # the encoder, so the forward pass is deterministic.
    in_features = 32
    hidden_sizes = 32

    key = jax.random.PRNGKey(0)
    kx, kw1, kb1, kw2, kb2, kxb = jax.random.split(key, 6)

    w1 = jax.random.normal(kw1, (in_features, hidden_sizes), jnp.float32) * 0.1
    b1 = jax.random.normal(kb1, (hidden_sizes,), jnp.float32) * 0.1
    w2 = jax.random.normal(kw2, (hidden_sizes, hidden_sizes), jnp.float32) * 0.1
    b2 = jax.random.normal(kb2, (hidden_sizes,), jnp.float32) * 0.1

    # 1) Small batch, f32 matmuls: gridless path, near-exact vs. the reference.
    batch = 8
    x = jax.random.normal(kx, (batch, in_features), jnp.float32)
    mlp_f32 = MLPProtoPallas(w1, b1, w2, b2, compute_dtype=jnp.float32)
    out = jax.block_until_ready(mlp_f32(x))
    ref = reference_forward(x, w1, b1, w2, b2)
    assert out.shape == (batch, hidden_sizes)
    assert jnp.allclose(out, ref, atol=1e-4, rtol=1e-4), "small-batch mismatch"

    # 2) Ragged larger batch, bf16 matmuls (default): tiled path with 8 grid
    #    steps (block_m=128) and a masked/partial last block (1000 % 128 != 0).
    big_batch = 1000
    xb = jax.random.normal(kxb, (big_batch, in_features), jnp.float32)
    mlp_bf16 = MLPProtoPallas(w1, b1, w2, b2, block_m=128)
    out_b = jax.block_until_ready(mlp_bf16(xb))
    ref_b = reference_forward(xb, w1, b1, w2, b2)
    assert out_b.shape == (big_batch, hidden_sizes)
    assert jnp.allclose(out_b, ref_b, atol=3e-2, rtol=3e-2), "tiled/bf16 mismatch"

    print("KERNEL_OK")
</pallas_src>

<mosaic_0001>
module attributes {stable_mosaic.version = 11 : i64} {
  func.func @_mlp_proto_kernel(%arg0: memref<8x32xf32, #tpu.memory_space<vmem>>, %arg1: memref<32x32xf32, #tpu.memory_space<vmem>>, %arg2: memref<1x32xf32, #tpu.memory_space<vmem>>, %arg3: memref<32x32xf32, #tpu.memory_space<vmem>>, %arg4: memref<1x32xf32, #tpu.memory_space<vmem>>, %arg5: memref<8x32xf32, #tpu.memory_space<vmem>>) attributes {dimension_semantics = [], scalar_prefetch = 0 : i64, scratch_operands = 0 : i64, tpu.core_type = #tpu.core_type<tc>} {
    %c0 = arith.constant 0 : index
    %c0_0 = arith.constant 0 : index
    %0 = vector.load %arg0[%c0, %c0_0] : memref<8x32xf32, #tpu.memory_space<vmem>>, vector<8x32xf32>
    %c0_1 = arith.constant 0 : index
    %c0_2 = arith.constant 0 : index
    %1 = vector.load %arg1[%c0_1, %c0_2] : memref<32x32xf32, #tpu.memory_space<vmem>>, vector<32x32xf32>
    %cst = arith.constant dense<0.000000e+00> : vector<8x32xf32>
    %2 = tpu.matmul %0, %1, %cst {dimension_numbers = #tpu.dot_dimension_numbers<[1], [0], [0], [1], [0, 0, 1, 1], [], []>, precision = #tpu.contract_precision<fp32>} : vector<8x32xf32>, vector<32x32xf32>, vector<8x32xf32> -> vector<8x32xf32>
    %c0_3 = arith.constant 0 : index
    %c0_4 = arith.constant 0 : index
    %3 = vector.load %arg2[%c0_3, %c0_4] : memref<1x32xf32, #tpu.memory_space<vmem>>, vector<1x32xf32>
    %4 = vector.broadcast %3 : vector<1x32xf32> to vector<8x32xf32>
    %5 = arith.addf %2, %4 : vector<8x32xf32>
    %cst_5 = arith.constant 0.000000e+00 : f32
    %6 = vector.broadcast %cst_5 : f32 to vector<8x32xf32>
    %7 = arith.maximumf %5, %6 : vector<8x32xf32>
    %c0_6 = arith.constant 0 : index
    %c0_7 = arith.constant 0 : index
    %8 = vector.load %arg3[%c0_6, %c0_7] : memref<32x32xf32, #tpu.memory_space<vmem>>, vector<32x32xf32>
    %cst_8 = arith.constant dense<0.000000e+00> : vector<8x32xf32>
    %9 = tpu.matmul %7, %8, %cst_8 {dimension_numbers = #tpu.dot_dimension_numbers<[1], [0], [0], [1], [0, 0, 1, 1], [], []>, precision = #tpu.contract_precision<fp32>} : vector<8x32xf32>, vector<32x32xf32>, vector<8x32xf32> -> vector<8x32xf32>
    %c0_9 = arith.constant 0 : index
    %c0_10 = arith.constant 0 : index
    %10 = vector.load %arg4[%c0_9, %c0_10] : memref<1x32xf32, #tpu.memory_space<vmem>>, vector<1x32xf32>
    %11 = vector.broadcast %10 : vector<1x32xf32> to vector<8x32xf32>
    %12 = arith.addf %9, %11 : vector<8x32xf32>
    %c0_11 = arith.constant 0 : index
    %c0_12 = arith.constant 0 : index
    %13 = vector.load %arg5[%c0_11, %c0_12] : memref<8x32xf32, #tpu.memory_space<vmem>>, vector<8x32xf32>
    tpu.vector_store %arg5[%c0_11, %c0_12], %12 {strides = array<i32>} : memref<8x32xf32, #tpu.memory_space<vmem>>, vector<8x32xf32>,
    return
  }
}

</mosaic_0001>

<bundles_post_ra>
// kernel: _mlp_proto_forward.1
= control target key start
LH: loop header
LB: loop body
LE: loop exit
PB: predicated region body
PF: predicated region fallthrough
CT: control target
= control target key end

     0   :  { %10 = vsyncpa [#allocation3], 0  ;;  %s647_s0 = inlined_call_operand.hbm [shape: f32[8,32], index: 0, kind: input, shape index: {}]   ;;  %s648_s1 = inlined_call_operand.hbm [shape: f32[32,32], index: 1, kind: input, shape index: {}]   ;;  %s649_s2 = inlined_call_operand.vmem [shape: f32[1,32], index: 2, kind: input, shape index: {}]   ;;  %s650_s3 = inlined_call_operand.hbm [shape: f32[32,32], index: 3, kind: input, shape index: {}]   ;;  %s651_s4 = inlined_call_operand.vmem [shape: f32[1,32], index: 4, kind: input, shape index: {}]   ;;  %s652_s5 = inlined_call_operand.hbm [shape: f32[8,32], index: 5, kind: output, shape index: {}]  }
   0x1   :  { %11 = vsyncpa [#allocation6], 0  ;;  %s28_s20 = sshll.u32 %s648_s1, 4  ;;  %s29_s20 = int_to_ptr.hbm [resolvable:$true] %s28_s20 }
   0x2   :  { %12 = vsyncpa [#allocation4], 0  ;;  %s590_s21 = smov [#allocation5]   ;;  %s18_s25 = sshll.u32 %s647_s0, 4  ;;  %s19_s25 = int_to_ptr.hbm [resolvable:$true] %s18_s25 }
   0x3   :  { %s30_s22 = sshll.u32 %s590_s21, 4  ;;  %s591_s26 = smov 128   ;;  %s31_s22 = int_to_ptr.vmem [resolvable:$true] %s30_s22 }
   0x4   :  { %s592_s27 = smov 8   ;;  %s593_s28 = smov [#allocation2]  }
   0x5   :  { %36 = dma.hbm_to_vmem [thread:$0]  %s29_s20, 512, %s31_s22, [#allocation6], %s591_s26, %s591_s26, %s592_s27  }
   0x6   :  { %s20_s29 = sshll.u32 %s593_s28, 4  ;;  %s43_s7 = sshll.u32 %s650_s3, 4  ;;  %s21_s29 = int_to_ptr.vmem [resolvable:$true] %s20_s29  ;;  %s44_s7 = int_to_ptr.hbm [resolvable:$true] %s43_s7 }
   0x7   :  { %23 = dma.hbm_to_vmem [thread:$0]  %s19_s25, 128, %s21_s29, [#allocation3]  }
   0x8   :  { %s594_s1 = smov [#allocation7]  }
   0x9   :  { %s45_s8 = sshll.u32 %s594_s1, 4  ;;  %s46_s8 = int_to_ptr.vmem [resolvable:$true] %s45_s8 }
   0xa   :  { %51 = dma.hbm_to_vmem [thread:$0]  %s44_s7, 512, %s46_s8, [#allocation6], %s591_s26, %s591_s26, %s592_s27  }
   0xb   :  { %584 = dma.done.wait [#allocation3], 128  }
   0xc   :  { %585 = vsyncadd [#allocation3], 4294967168 }
   0xd   :  { %586 = dma.done.wait [#allocation6], 1024  }
   0xe   :  { %587 = vsyncadd [#allocation6], 4294966272  ;;  %vm75_vm0 = vcmask 261120   ;;  %v70_v0 = vld [vmem:[#allocation5 + $0x18] sm:$0xff]  ;;  %v69_v1 = vld [vmem:[#allocation5 + $0x10] sm:$0xff]  ;;  %s595_s10 = smov [#allocation8]  }
   0xf   :  { %v68_v2 = vld [vmem:[#allocation5 + $0x8] sm:$0xff]  ;;  %v91_v3 = vand.u32 4294901760, %v70_v0  ;;  %v93_v4 = vand.u32 4294901760, %v69_v1  ;;  %v67_v6 = vld [vmem:[#allocation5] sm:$0xff]  ;;  %v66_v7 = vld [vmem:[#allocation2] sm:$0xff]  ;;  %s467_s11 = sshll.u32 %s595_s10, 4  ;;  %s468_s11 = int_to_ptr.vmem [resolvable:$true] %s467_s11 }
  0x10   :  { %v95_v5 = vand.u32 4294901760, %v68_v2  ;;  %v97_v8 = vand.u32 4294901760, %v67_v6  ;;  %v77_v9 = vsel %vm75_vm0, %v66_v7, 0  ;;  %v268_v31 = vld [vmem:[#allocation7 + $0x18] sm:$0xff]  ;;  %v267_v33 = vld [vmem:[#allocation7 + $0x10] sm:$0xff]  ;;  %v266_v36 = vld [vmem:[#allocation7 + $0x8] sm:$0xff] }
  0x11   :  { %v121_v10 = vsub.f32 %v70_v0, %v91_v3  ;;  %92 = vmatpush.msra.mxu0 %v91_v3  ;;  %v127_v11 = vsub.f32 %v69_v1, %v93_v4  ;;  %192 = vmatpush.msra.mxu3 %v91_v3  ;;  %v99_v13 = vand.u32 4294901760, %v77_v9  ;;  %v288_v32 = vand.u32 4294901760, %v268_v31  ;;  %v265_v40 = vld [vmem:[#allocation7] sm:$0xff]  ;;  %v486_v55 = vld [vmem:[%s649_s2] ss:$0 sm:$0xff]  ;;  %s469_s14 = sshll.u32 %s652_s5, 4  ;;  %s470_s14 = int_to_ptr.hbm [resolvable:$true] %s469_s14 }
  0x12   :  { %v133_v12 = vsub.f32 %v68_v2, %v95_v5  ;;  %v139_v14 = vsub.f32 %v67_v6, %v97_v8  ;;  %v290_v35 = vand.u32 4294901760, %v267_v33  ;;  %v292_v39 = vand.u32 4294901760, %v266_v36 }
  0x13   :  { %163 = vmatpush.msra.mxu2 %v121_v10  ;;  %94 = vmatpush.msra.mxu0 %v93_v4  ;;  %v122_v15 = vand.u32 4294901760, %v121_v10  ;;  %v128_v16 = vand.u32 4294901760, %v127_v11  ;;  %v100_v17 = vsub.f32 %v77_v9, %v99_v13  ;;  %v318_v34 = vsub.f32 %v268_v31, %v288_v32 }
  0x14   :  { %v134_v18 = vand.u32 4294901760, %v133_v12  ;;  %194 = vmatpush.msra.mxu3 %v93_v4  ;;  %v140_v19 = vand.u32 4294901760, %v139_v14  ;;  %v324_v38 = vsub.f32 %v267_v33, %v290_v35  ;;  %v330_v43 = vsub.f32 %v266_v36, %v292_v39 }
  0x15   :  { %166 = vmatpush.msra.mxu2 %v127_v11  ;;  %v123_v20 = vsub.f32 %v121_v10, %v122_v15  ;;  %96 = vmatpush.msra.mxu0 %v95_v5  ;;  %v129_v21 = vsub.f32 %v127_v11, %v128_v16  ;;  %v101_v23 = vand.u32 4294901760, %v100_v17  ;;  %v319_v37 = vand.u32 4294901760, %v318_v34  ;;  %v487_v11 = vld [vmem:[%s651_s4] ss:$0 sm:$0xff] }
  0x16   :  { %v135_v22 = vsub.f32 %v133_v12, %v134_v18  ;;  %196 = vmatpush.msra.mxu3 %v95_v5  ;;  %v141_v27 = vsub.f32 %v139_v14, %v140_v19  ;;  %v325_v42 = vand.u32 4294901760, %v324_v38  ;;  %v294_v44 = vand.u32 4294901760, %v265_v40 }
  0x17   :  { %v124_v24 = vand.u32 4294901760, %v123_v20  ;;  %169 = vmatpush.msra.mxu2 %v133_v12  ;;  %v130_v25 = vand.u32 4294901760, %v129_v21  ;;  %98 = vmatpush.msra.mxu0 %v97_v8  ;;  %v102_v26 = vsub.f32 %v100_v17, %v101_v23  ;;  %v320_v41 = vsub.f32 %v318_v34, %v319_v37 }
  0x18   :  { %198 = vmatpush.msra.mxu3 %v97_v8  ;;  %v136_v28 = vand.u32 4294901760, %v135_v22  ;;  %v142_v30 = vand.u32 4294901760, %v141_v27  ;;  %v326_v46 = vsub.f32 %v324_v38, %v325_v42  ;;  %v331_v47 = vand.u32 4294901760, %v330_v43 }
  0x19   :  { %221 = vmatpush.msrb.mxu0 %v122_v15  ;;  %125 = vmatpush.msra.mxu1 %v124_v24  ;;  %v103_v29 = vand.u32 4294901760, %v102_v26  ;;  %v321_v45 = vand.u32 4294901760, %v320_v41  ;;  %v336_v48 = vsub.f32 %v265_v40, %v294_v44 }
  0x1a   :  { %172 = vmatpush.msra.mxu2 %v139_v14  ;;  %202 = vmatmul.f32.vlgmr.msra.gmra.mxu3 %v101_v23  ;;  %v327_v49 = vand.u32 4294901760, %v326_v46  ;;  %v332_v50 = vsub.f32 %v330_v43, %v331_v47 }
  0x1b   :  { %175 = vmatmul.f32.vlgmr.msra.gmra.mxu2 %v100_v17  ;;  %131 = vmatpush.msra.mxu1 %v130_v25  ;;  %v337_v51 = vand.u32 4294901760, %v336_v48 }
  0x1c   :  { %104 = vmatmul.f32.vlgmr.msra.gmra.mxu0 %v103_v29  ;;  %289 = vmatpush.msrb.mxu2 %v288_v32  ;;  %v333_v52 = vand.u32 4294901760, %v332_v50 }
  0x1d   :  { %225 = vmatpush.msrb.mxu0 %v128_v16  ;;  %137 = vmatpush.msra.mxu1 %v136_v28  ;;  %v338_v53 = vsub.f32 %v336_v48, %v337_v51 }
  0x1e   :  { %291 = vmatpush.msrb.mxu2 %v290_v35  ;;  %322 = vmatpush.msrb.mxu3 %v321_v45 }
  0x1f   :  { %229 = vmatpush.msrb.mxu0 %v134_v18  ;;  %143 = vmatpush.msra.mxu1 %v142_v30  ;;  %v339_v54 = vand.u32 4294901760, %v338_v53 }
  0x20   :  { %145 = vmatmul.f32.vlgmr.msra.gmra.mxu1 %v99_v13  ;;  %293 = vmatpush.msrb.mxu2 %v292_v39 }
  0x21   :  { %233 = vmatpush.msrb.mxu0 %v140_v19  ;;  %252 = vmatpush.msrb.mxu1 %v91_v3 }
  0x22   :  { %295 = vmatpush.msrb.mxu2 %v294_v44  ;;  %328 = vmatpush.msrb.mxu3 %v327_v49 }
  0x23   :  { %254 = vmatpush.msrb.mxu1 %v93_v4  ;;  %360 = vmatpush.msra.mxu0 %v318_v34 }
  0x24   :  { %235 = vmatmul.f32.vlgmr.msrb.gmra.mxu0 %v99_v13  ;;  %418 = vmatpush.msra.mxu2 %v319_v37 }
  0x25   :  { %256 = vmatpush.msrb.mxu1 %v95_v5  ;;  %363 = vmatpush.msra.mxu0 %v324_v38 }
  0x26   :  { %422 = vmatpush.msra.mxu2 %v325_v42  ;;  %334 = vmatpush.msrb.mxu3 %v333_v52 }
  0x27   :  { %258 = vmatpush.msrb.mxu1 %v97_v8  ;;  %366 = vmatpush.msra.mxu0 %v330_v43 }
  0x28   :  { %260 = vmatmul.f32.vlgmr.msrb.gmra.mxu1 %v99_v13  ;;  %426 = vmatpush.msra.mxu2 %v331_v47 }
  0x29   :  { %389 = vmatpush.msra.mxu1 %v288_v32  ;;  %369 = vmatpush.msra.mxu0 %v336_v48 }
  0x2a   :  { %340 = vmatpush.msrb.mxu3 %v339_v54  ;;  %430 = vmatpush.msra.mxu2 %v337_v51 }
  0x2b   :  { %391 = vmatpush.msra.mxu1 %v290_v35 }
  0x2c   :  { %449 = vmatpush.msra.mxu3 %v288_v32 }
  0x2d   :  { %393 = vmatpush.msra.mxu1 %v292_v39 }
  0x2e   :  { %451 = vmatpush.msra.mxu3 %v290_v35 }
  0x2f   :  { %395 = vmatpush.msra.mxu1 %v294_v44 }
  0x30   :  { %453 = vmatpush.msra.mxu3 %v292_v39 }
  0x32   :  { %455 = vmatpush.msra.mxu3 %v294_v44 }
  0x99   :  { %v105_v56 = vpop.f32.mrf.mxu0 }
  0x9a   :  { %v106_v57 = vadd.f32 %v486_v55, %v105_v56 }
  0x9d   :  { %v146_v58 = vpop.f32.mrf.mxu1  ;;  %v203_v61 = vpop.f32.mrf.mxu3 }
  0x9e   :  { %v176_v59 = vpop.f32.mrf.mxu2  ;;  %v147_v60 = vadd.f32 %v146_v58, %v106_v57 }
  0xa0   :  { %v177_v62 = vadd.f32 %v176_v59, %v147_v60 }
  0xa1   :  { %v236_v63 = vpop.f32.mrf.mxu0 }
  0xa2   :  { %v204_v0 = vadd.f32 %v203_v61, %v177_v62 }
  0xa4   :  { %v237_v1 = vadd.f32 %v236_v63, %v204_v0 }
  0xa5   :  { %v261_v2 = vpop.f32.mrf.mxu1 }
  0xa6   :  { %v262_v3 = vadd.f32 %v261_v2, %v237_v1 }
  0xa8   :  { %v264_v4 = vmax.f32 %v262_v3, 0.0 }
  0xaa   :  { %v274_v5 = vsel %vm75_vm0, %v264_v4, 0 }
  0xab   :  { %v296_v6 = vand.u32 4294901760, %v274_v5 }
  0xad   :  { %v297_v7 = vsub.f32 %v274_v5, %v296_v6  ;;  %342 = vmatmul.f32.vlgmr.msrb.gmra.mxu3 %v296_v6 }
  0xaf   :  { %372 = vmatmul.f32.vlgmr.msra.gmra.mxu0 %v297_v7  ;;  %v298_v8 = vand.u32 4294901760, %v297_v7 }
  0xb1   :  { %399 = vmatmul.f32.vlgmr.msra.gmra.mxu1 %v298_v8  ;;  %v299_v9 = vsub.f32 %v297_v7, %v298_v8 }
  0xb3   :  { %v300_v10 = vand.u32 4294901760, %v299_v9 }
  0xb5   :  { %301 = vmatmul.f32.vlgmr.msrb.gmra.mxu2 %v300_v10  ;;  %457 = vmatmul.f32.vlgmr.msra.gmra.mxu3 %v296_v6 }
  0xbd   :  { %432 = vmatmul.f32.vlgmr.msra.gmra.mxu2 %v296_v6 }
 0x12c   :  { %v373_v16 = vpop.f32.mrf.mxu0 }
 0x12e   :  { %v400_v18 = vpop.f32.mrf.mxu1 }
 0x130   :  { %v343_v12 = vpop.f32.mrf.mxu3 }
 0x138   :  { %v302_v13 = vpop.f32.mrf.mxu2  ;;  %v458_v22 = vpop.f32.mrf.mxu3 }
 0x139   :  { %v303_v14 = vadd.f32 %v487_v11, %v302_v13 }
 0x13b   :  { %v344_v15 = vadd.f32 %v343_v12, %v303_v14 }
 0x13d   :  { %v374_v17 = vadd.f32 %v373_v16, %v344_v15 }
 0x13f   :  { %v401_v19 = vadd.f32 %v400_v18, %v374_v17 }
 0x140   :  { %v433_v20 = vpop.f32.mrf.mxu2 }
 0x141   :  { %v434_v21 = vadd.f32 %v433_v20, %v401_v19 }
 0x143   :  { %v459_v23 = vadd.f32 %v458_v22, %v434_v21 }
 0x145   :  { %461 = vst.msk [vmem:[#allocation8] sm:$0xff] %vm75_vm0, %v459_v23 }
 0x146   :  { %472 = dma.vmem_to_hbm [thread:$0]  %s468_s11, 128, %s470_s14, [#allocation4]  }
 0x147   :  { %588 = dma.done.wait [#allocation4], 128  }
 0x148   :  { %589 = vsyncadd [#allocation4], 4294967168 }
 0x149   :  { %477 = vsyncpa [#allocation3], 1 }
 0x14a   :  { %478 = vsyncpa [#allocation6], 1 }
 0x14b   :  { %479 = vsyncpa [#allocation4], 1 }

</bundles_post_ra>
